<compile_context>
chip_gen: v7x
topology: tpu7x:2x2x1
jax: 0.10.0
libtpu: 0.0.40
codegen_flags: <defaults>
</compile_context>

<pallas_src>
import numpy as np
import jax
import jax.numpy as jnp
from jax import lax
from jax.experimental import pallas as pl
from jax.experimental.pallas import tpu as pltpu

_NEG = -1e30
_VMEM_LIMIT = 32 * 1024 * 1024  # safe on v5e/v6e (128 MiB) and v7x (64 MiB)


def _round_up(x, m):
    return ((x + m - 1) // m) * m


def _pick_row_tile(rows, target):
    """Largest multiple-of-8 divisor of `rows` that is <= target (rows % 8 == 0)."""
    t = min(rows, target)
    t -= t % 8
    t = max(t, 8)
    while rows % t:
        t -= 8
    return t


def _cparams(*sem):
    return pltpu.CompilerParams(dimension_semantics=tuple(sem),
                                vmem_limit_bytes=_VMEM_LIMIT)


# ----------------------------------------------------------------------------
# Kernel 1: Conv1d(k=3, pad=1) + bias + ReLU + BatchNorm affine (eval mode)
# ----------------------------------------------------------------------------
def conv_relu_bn_kernel(x_ref, w_ref, b_ref, scale_ref, shift_ref, o_ref):
    # x_ref: (1, Tp+8, Cin) bf16 (resident per batch row)
    # w_ref: (3, Cin, Cout) bf16    b/scale/shift: (1, Cout) f32
    # o_ref: (1, TILE_T, Cout) bf16
    tile_t = o_ref.shape[1]
    j = pl.program_id(1)
    t0 = pl.multiple_of(j * tile_t, 8)
    xw = x_ref[0, pl.ds(t0, tile_t + 8), :]            # aligned dynamic window
    y = jnp.dot(xw[0:tile_t], w_ref[0], preferred_element_type=jnp.float32)
    y = y + jnp.dot(xw[1:tile_t + 1], w_ref[1], preferred_element_type=jnp.float32)
    y = y + jnp.dot(xw[2:tile_t + 2], w_ref[2], preferred_element_type=jnp.float32)
    y = jnp.maximum(y + b_ref[...], 0.0)                               # bias + ReLU
    o_ref[0] = (y * scale_ref[...] + shift_ref[...]).astype(o_ref.dtype)  # BN affine


def conv1d_relu_bn(x, w, b, bn_scale, bn_shift, time_tile=256):
    """x: (B, T, Cin) bf16 channels-last.  w: (3, Cin, Cout) f32."""
    B, T, Cin = x.shape
    Cout = w.shape[-1]
    tile_t = min(time_tile, _round_up(T, 8))
    Tp = _round_up(T, tile_t)
    # left halo of 1 (conv pad) + right pad so every aligned (tile_t+8) window is in-bounds
    xp = jnp.pad(x, ((0, 0), (1, Tp - T + 7), (0, 0)))                 # (B, Tp+8, Cin)
    out = pl.pallas_call(
        conv_relu_bn_kernel,
        out_shape=jax.ShapeDtypeStruct((B, Tp, Cout), jnp.bfloat16),
        grid=(B, Tp // tile_t),
        in_specs=[pl.BlockSpec((1, Tp + 8, Cin), lambda bi, j: (bi, 0, 0)),
                  pl.BlockSpec((3, Cin, Cout), lambda bi, j: (0, 0, 0)),
                  pl.BlockSpec((1, Cout), lambda bi, j: (0, 0)),
                  pl.BlockSpec((1, Cout), lambda bi, j: (0, 0)),
                  pl.BlockSpec((1, Cout), lambda bi, j: (0, 0))],
        out_specs=pl.BlockSpec((1, tile_t, Cout), lambda bi, j: (bi, j, 0)),
        compiler_params=_cparams("parallel", "parallel"),
    )(xp, w.astype(jnp.bfloat16), b.reshape(1, Cout),
      bn_scale.reshape(1, Cout), bn_shift.reshape(1, Cout))
    return out[:, :T]


# ----------------------------------------------------------------------------
# Kernel 2: generic row-tiled matmul + bias (used for hoisted X @ W_ih gates)
# ----------------------------------------------------------------------------
def matmul_bias_kernel(x_ref, w_ref, b_ref, o_ref):
    o_ref[...] = (jnp.dot(x_ref[...], w_ref[...], preferred_element_type=jnp.float32)
                  + b_ref[...]).astype(o_ref.dtype)


def matmul_bias(x2d, w, b, tile_rows=512):
    """x2d: (R, D) bf16, w: (D, N) bf16, b: (1, N) f32 -> (R, N) f32."""
    R, D = x2d.shape
    N = w.shape[-1]
    tr = _pick_row_tile(R, tile_rows)
    return pl.pallas_call(
        matmul_bias_kernel,
        out_shape=jax.ShapeDtypeStruct((R, N), jnp.float32),
        grid=(R // tr,),
        in_specs=[pl.BlockSpec((tr, D), lambda i: (i, 0)),
                  pl.BlockSpec((D, N), lambda i: (0, 0)),
                  pl.BlockSpec((1, N), lambda i: (0, 0))],
        out_specs=pl.BlockSpec((tr, N), lambda i: (i, 0)),
        compiler_params=_cparams("parallel"),
    )(x2d, w, b)


# ----------------------------------------------------------------------------
# Kernel 3: fused bidirectional LSTM recurrence (time-chunked, state carried)
# ----------------------------------------------------------------------------
def bilstm_rec_kernel(gxf_ref, gxb_ref, mf_ref, mb_ref, whh_ref,
                      of_ref, ob_ref, hf_sc, cf_sc, hb_sc, cb_sc):
    # gxf_ref: (C, Bp, 4H) f32 fwd x-gates (+bias) for time chunk k
    # gxb_ref: (C, Bp, 4H) f32 bwd x-gates (+bias) for time chunk K-1-k
    # mf_ref/mb_ref: (C, Bp, 1) f32 validity masks for those chunks
    # whh_ref: (2H, 8H) bf16 block-diagonal stacked recurrent weights
    # of_ref/ob_ref: (C, Bp, H) f32 hidden outputs; *_sc: (Bp, H) f32 state
    C = of_ref.shape[0]
    H = of_ref.shape[-1]

    @pl.when(pl.program_id(0) == 0)
    def _():
        hf_sc[...] = jnp.zeros_like(hf_sc)
        cf_sc[...] = jnp.zeros_like(cf_sc)
        hb_sc[...] = jnp.zeros_like(hb_sc)
        cb_sc[...] = jnp.zeros_like(cb_sc)

    def cell(gates, c_prev):
        # full-vreg transcendentals, then static gate slices (i, f, g, o order)
        sg = jax.nn.sigmoid(gates)
        th = jnp.tanh(gates)
        i_g = sg[:, 0:H]
        f_g = sg[:, H:2 * H]
        g_g = th[:, 2 * H:3 * H]
        o_g = sg[:, 3 * H:4 * H]
        c_new = f_g * c_prev + i_g * g_g
        h_new = o_g * jnp.tanh(c_new)
        return h_new, c_new

    def step(s, carry):
        sr = C - 1 - s                                       # reversed local time (bwd)
        h_cat = jnp.concatenate([hf_sc[...], hb_sc[...]], axis=-1)      # (Bp, 2H)
        rec = jnp.dot(h_cat.astype(whh_ref.dtype), whh_ref[...],
                      preferred_element_type=jnp.float32)               # (Bp, 8H)
        hf, cf = cell(gxf_ref[s] + rec[:, 0:4 * H], cf_sc[...])
        hb, cb = cell(gxb_ref[sr] + rec[:, 4 * H:8 * H], cb_sc[...])
        mf = mf_ref[s]                                        # (Bp, 1)
        mb = mb_ref[sr]
        hf_sc[...] = mf * hf + (1.0 - mf) * hf_sc[...]
        cf_sc[...] = mf * cf + (1.0 - mf) * cf_sc[...]
        hb_sc[...] = mb * hb + (1.0 - mb) * hb_sc[...]
        cb_sc[...] = mb * cb + (1.0 - mb) * cb_sc[...]
        of_ref[s] = mf * hf                                   # padded steps -> 0
        ob_ref[sr] = mb * hb
        return carry

    lax.fori_loop(0, C, step, 0)


def lstm_recurrence(gx, mask, w_hh_stack, H, t_chunk):
    """gx: (Tp, Bp, 8H) f32 precomputed gates [fwd 4H | bwd 4H]; mask: (Tp, Bp, 1)."""
    Tp, Bp, _ = gx.shape
    C = t_chunk
    K = Tp // C
    of, ob = pl.pallas_call(
        bilstm_rec_kernel,
        out_shape=(jax.ShapeDtypeStruct((Tp, Bp, H), jnp.float32),
                   jax.ShapeDtypeStruct((Tp, Bp, H), jnp.float32)),
        grid=(K,),
        in_specs=[pl.BlockSpec((C, Bp, 4 * H), lambda k: (k, 0, 0)),
                  pl.BlockSpec((C, Bp, 4 * H), lambda k: (K - 1 - k, 0, 1)),
                  pl.BlockSpec((C, Bp, 1), lambda k: (k, 0, 0)),
                  pl.BlockSpec((C, Bp, 1), lambda k: (K - 1 - k, 0, 0)),
                  pl.BlockSpec((2 * H, 8 * H), lambda k: (0, 0))],
        out_specs=(pl.BlockSpec((C, Bp, H), lambda k: (k, 0, 0)),
                   pl.BlockSpec((C, Bp, H), lambda k: (K - 1 - k, 0, 0))),
        scratch_shapes=[pltpu.VMEM((Bp, H), jnp.float32) for _ in range(4)],
        compiler_params=_cparams("arbitrary"),
    )(gx, gx, mask, mask, w_hh_stack)
    return of, ob


def bilstm(x_tm, mask, lstm_params, H, t_chunk):
    """x_tm: (Tp, Bp, D) bf16 time-major.  Returns (Tp, Bp, 2H) bf16."""
    Tp, Bp, _ = x_tm.shape
    out = x_tm
    for p in lstm_params:
        D = out.shape[-1]
        gx = matmul_bias(out.reshape(Tp * Bp, D),
                         p["w_ih"].astype(jnp.bfloat16),
                         p["b"].reshape(1, -1))                # (Tp*Bp, 8H) f32
        gx = gx.reshape(Tp, Bp, 8 * H)
        of, ob = lstm_recurrence(gx, mask, p["w_hh"].astype(jnp.bfloat16), H, t_chunk)
        out = jnp.concatenate([of, ob], axis=-1).astype(jnp.bfloat16)
    return out


# ----------------------------------------------------------------------------
# Kernel 4: classifier  Linear -> ReLU -> Linear -> log_softmax (lane-dense V)
# ----------------------------------------------------------------------------
def classifier_kernel(x_ref, w1_ref, b1_ref, w2_ref, b2_ref, o_ref):
    h = jnp.dot(x_ref[...], w1_ref[...], preferred_element_type=jnp.float32) + b1_ref[...]
    h = jnp.maximum(h, 0.0)
    logits = jnp.dot(h.astype(w2_ref.dtype), w2_ref[...],
                     preferred_element_type=jnp.float32) + b2_ref[...]
    m = jnp.max(logits, axis=-1, keepdims=True)
    s = logits - m
    lse = jnp.log(jnp.sum(jnp.exp(s), axis=-1, keepdims=True))
    o_ref[...] = s - lse


def classifier(x2d, w1, b1, w2, b2, vocab_size, tile_rows=512):
    """x2d: (R, 2H) bf16 -> (R, V) f32 log-probs."""
    R, D2 = x2d.shape
    V = vocab_size
    Vp = _round_up(V, 128)
    w2p = jnp.pad(w2, ((0, 0), (0, Vp - V))).astype(jnp.bfloat16)
    b2p = jnp.pad(b2, (0, Vp - V), constant_values=_NEG).reshape(1, Vp)  # pad -> -inf-ish
    tr = _pick_row_tile(R, tile_rows)
    out = pl.pallas_call(
        classifier_kernel,
        out_shape=jax.ShapeDtypeStruct((R, Vp), jnp.float32),
        grid=(R // tr,),
        in_specs=[pl.BlockSpec((tr, D2), lambda i: (i, 0)),
                  pl.BlockSpec((D2, D2), lambda i: (0, 0)),
                  pl.BlockSpec((1, D2), lambda i: (0, 0)),
                  pl.BlockSpec((D2, Vp), lambda i: (0, 0)),
                  pl.BlockSpec((1, Vp), lambda i: (0, 0))],
        out_specs=pl.BlockSpec((tr, Vp), lambda i: (i, 0)),
        compiler_params=_cparams("parallel"),
    )(x2d, w1.astype(jnp.bfloat16), b1.reshape(1, D2), w2p, b2p)
    return out[:, :V]


# ----------------------------------------------------------------------------
# parameter construction (deterministic) and full forward
# ----------------------------------------------------------------------------
def init_params(key, feature_size, hidden_size, num_layers, vocab_size):
    H = hidden_size
    conv_channels = [(feature_size, 128), (128, 128), (128, 256), (256, 256), (256, 256)]
    params = {"cnn": [], "lstm": [], "cls": {}}
    eps = 1e-5

    for (cin, cout) in conv_channels:
        key, kw, kb = jax.random.split(key, 3)
        w = 0.05 * jax.random.normal(kw, (3, cin, cout), jnp.float32)
        b = 0.05 * jax.random.normal(kb, (cout,), jnp.float32)
        gamma = jnp.ones((cout,), jnp.float32)
        beta = jnp.zeros((cout,), jnp.float32)
        r_mean = jnp.zeros((cout,), jnp.float32)
        r_var = jnp.ones((cout,), jnp.float32)
        scale = gamma / jnp.sqrt(r_var + eps)
        shift = beta - r_mean * scale
        params["cnn"].append((w, b, scale, shift))

    for layer in range(num_layers):
        d_in = 256 if layer == 0 else 2 * H
        key, k1, k2, k3, k4, k5, k6, k7, k8 = jax.random.split(key, 9)
        w_ih_f = 0.05 * jax.random.normal(k1, (d_in, 4 * H), jnp.float32)
        w_hh_f = 0.05 * jax.random.normal(k2, (H, 4 * H), jnp.float32)
        b_f = 0.05 * (jax.random.normal(k3, (4 * H,), jnp.float32)
                      + jax.random.normal(k4, (4 * H,), jnp.float32))   # b_ih + b_hh
        w_ih_b = 0.05 * jax.random.normal(k5, (d_in, 4 * H), jnp.float32)
        w_hh_b = 0.05 * jax.random.normal(k6, (H, 4 * H), jnp.float32)
        b_b = 0.05 * (jax.random.normal(k7, (4 * H,), jnp.float32)
                      + jax.random.normal(k8, (4 * H,), jnp.float32))
        # stacked for the fused bidirectional kernel: columns = [fwd 4H | bwd 4H]
        w_ih = jnp.concatenate([w_ih_f, w_ih_b], axis=1)                # (d_in, 8H)
        w_hh = jnp.zeros((2 * H, 8 * H), jnp.float32)
        w_hh = w_hh.at[:H, :4 * H].set(w_hh_f).at[H:, 4 * H:].set(w_hh_b)
        b = jnp.concatenate([b_f, b_b])                                 # (8H,)
        params["lstm"].append({"w_ih": w_ih, "w_hh": w_hh, "b": b})

    key, k1, k2, k3, k4 = jax.random.split(key, 5)
    params["cls"]["w1"] = 0.05 * jax.random.normal(k1, (2 * H, 2 * H), jnp.float32)
    params["cls"]["b1"] = 0.05 * jax.random.normal(k2, (2 * H,), jnp.float32)
    params["cls"]["w2"] = 0.05 * jax.random.normal(k3, (2 * H, vocab_size), jnp.float32)
    params["cls"]["b2"] = 0.05 * jax.random.normal(k4, (vocab_size,), jnp.float32)
    return params


def speechnet_forward(params, x_padded, x_lens_np, hidden_size, num_layers, vocab_size):
    """x_padded: (B, T, F) f32 batch-first / feature-last.  x_lens_np: np.int32 (B,).
    Returns (log_probs (B, Tmax, V) f32, output_lens)."""
    B, T, F = x_padded.shape
    H = hidden_size
    lens = np.asarray(x_lens_np, dtype=np.int32)

    # CNN stack (channels-last; math identical to PyTorch's NCL layout)
    h = x_padded.astype(jnp.bfloat16)
    for (w, b, scale, shift) in params["cnn"]:
        h = conv1d_relu_bn(h, w, b, scale, shift)

    # pack_padded / pad_packed semantics: output truncated to max(x_lens)
    Tmax = int(np.max(lens))
    h = h[:, :Tmax]                                            # (B, Tmax, 256) bf16

    # pad batch to 8 sublanes and time to a multiple of the recurrence chunk
    Bp = _round_up(B, 8)
    t_chunk = min(128, _round_up(Tmax, 8))
    Tp = _round_up(Tmax, t_chunk)

    x_tm = jnp.transpose(h, (1, 0, 2))                         # (Tmax, B, 256)
    x_tm = jnp.pad(x_tm, ((0, Tp - Tmax), (0, Bp - B), (0, 0)))

    lens_p = np.zeros((Bp,), np.int32)
    lens_p[:B] = lens
    mask = (np.arange(Tp)[:, None] < lens_p[None, :]).astype(np.float32)[..., None]
    mask = jnp.asarray(mask)                                   # (Tp, Bp, 1)

    lstm_out = bilstm(x_tm, mask, params["lstm"], H, t_chunk)  # (Tp, Bp, 2H) bf16

    logp = classifier(lstm_out.reshape(Tp * Bp, 2 * H),
                      params["cls"]["w1"], params["cls"]["b1"],
                      params["cls"]["w2"], params["cls"]["b2"], vocab_size)
    logp = logp.reshape(Tp, Bp, vocab_size)
    logp = jnp.transpose(logp, (1, 0, 2))[:B, :Tmax]           # (B, Tmax, V)
    output_lens = jnp.asarray(lens)
    return logp, output_lens


# ----------------------------------------------------------------------------
if __name__ == "__main__":
    # args: use_pca=False, data_aug=False, feature_size=16, hidden_size=32,
    #       num_layers=2, vocab_size=10
    FEATURE = 16
    HIDDEN = 32
    LAYERS = 2
    VOCAB = 10
    B, T = 2, 16

    key = jax.random.PRNGKey(0)
    key, kx = jax.random.split(key)
    x_padded = jax.random.normal(kx, (B, T, FEATURE), jnp.float32)
    x_lens = np.array([16, 11], dtype=np.int32)

    params = init_params(key, FEATURE, HIDDEN, LAYERS, VOCAB)

    out, out_lens = speechnet_forward(params, x_padded, x_lens, HIDDEN, LAYERS, VOCAB)
    out = jax.block_until_ready(out)
    out_lens = jax.block_until_ready(out_lens)

    assert out.shape == (B, int(x_lens.max()), VOCAB)
    assert out.dtype == jnp.float32
    # log_softmax rows must sum to ~1 in prob space (computed in f32 in-kernel)
    assert np.allclose(np.exp(np.asarray(out)).sum(-1), 1.0, atol=1e-3)
    print("KERNEL_OK")
</pallas_src>

<mosaic_0001>
module attributes {stable_mosaic.version = 11 : i64} {
  func.func @conv_relu_bn_kernel(%arg0: i32, %arg1: i32, %arg2: memref<1x24x16xbf16, #tpu.memory_space<vmem>>, %arg3: memref<3x16x128xbf16, #tpu.memory_space<vmem>>, %arg4: memref<1x128xf32, #tpu.memory_space<vmem>>, %arg5: memref<1x128xf32, #tpu.memory_space<vmem>>, %arg6: memref<1x128xf32, #tpu.memory_space<vmem>>, %arg7: memref<1x16x128xbf16, #tpu.memory_space<vmem>>) attributes {dimension_semantics = [#tpu.dimension_semantics<parallel>, #tpu.dimension_semantics<parallel>], iteration_bounds = array<i64: 2, 1>, scalar_prefetch = 0 : i64, scratch_operands = 0 : i64, tpu.core_type = #tpu.core_type<tc>, window_params = [{transform_indices = @transform_0, window_bounds = array<i64: 1, 24, 16>}, {pipeline_mode = #tpu.pipeline_mode<synchronous>, transform_indices = @transform_1, window_bounds = array<i64: 3, 16, 128>}, {pipeline_mode = #tpu.pipeline_mode<synchronous>, transform_indices = @transform_2, window_bounds = array<i64: 1, 128>}, {pipeline_mode = #tpu.pipeline_mode<synchronous>, transform_indices = @transform_3, window_bounds = array<i64: 1, 128>}, {pipeline_mode = #tpu.pipeline_mode<synchronous>, transform_indices = @transform_4, window_bounds = array<i64: 1, 128>}, {transform_indices = @transform_5, window_bounds = array<i64: 1, 16, 128>}]} {
    %c16_i32 = arith.constant 16 : i32
    %0 = arith.muli %arg1, %c16_i32 : i32
    %1 = tpu.assume_multiple %0, 8 : i32
    %c0 = arith.constant 0 : index
    %2 = arith.index_cast %1 : i32 to index
    %c0_0 = arith.constant 0 : index
    %3 = vector.load %arg2[%c0, %2, %c0_0] : memref<1x24x16xbf16, #tpu.memory_space<vmem>>, vector<1x24x16xbf16>
    %4 = vector.shape_cast %3 : vector<1x24x16xbf16> to vector<24x16xbf16>
    %5 = vector.extract_strided_slice %4 {offsets = [0, 0], sizes = [16, 16], strides = [1, 1]} : vector<24x16xbf16> to vector<16x16xbf16>
    %c0_1 = arith.constant 0 : index
    %c0_2 = arith.constant 0 : index
    %c0_3 = arith.constant 0 : index
    %6 = vector.load %arg3[%c0_1, %c0_2, %c0_3] : memref<3x16x128xbf16, #tpu.memory_space<vmem>>, vector<1x16x128xbf16>
    %7 = vector.shape_cast %6 : vector<1x16x128xbf16> to vector<16x128xbf16>
    %cst = arith.constant dense<0.000000e+00> : vector<16x128xf32>
    %8 = tpu.matmul %5, %7, %cst {dimension_numbers = #tpu.dot_dimension_numbers<[1], [0], [0], [1], [0, 0, 1, 1], [], []>} : vector<16x16xbf16>, vector<16x128xbf16>, vector<16x128xf32> -> vector<16x128xf32>
    %9 = vector.extract_strided_slice %4 {offsets = [1, 0], sizes = [16, 16], strides = [1, 1]} : vector<24x16xbf16> to vector<16x16xbf16>
    %c1 = arith.constant 1 : index
    %c0_4 = arith.constant 0 : index
    %c0_5 = arith.constant 0 : index
    %10 = vector.load %arg3[%c1, %c0_4, %c0_5] : memref<3x16x128xbf16, #tpu.memory_space<vmem>>, vector<1x16x128xbf16>
    %11 = vector.shape_cast %10 : vector<1x16x128xbf16> to vector<16x128xbf16>
    %cst_6 = arith.constant dense<0.000000e+00> : vector<16x128xf32>
    %12 = tpu.matmul %9, %11, %cst_6 {dimension_numbers = #tpu.dot_dimension_numbers<[1], [0], [0], [1], [0, 0, 1, 1], [], []>} : vector<16x16xbf16>, vector<16x128xbf16>, vector<16x128xf32> -> vector<16x128xf32>
    %13 = arith.addf %8, %12 : vector<16x128xf32>
    %14 = vector.extract_strided_slice %4 {offsets = [2, 0], sizes = [16, 16], strides = [1, 1]} : vector<24x16xbf16> to vector<16x16xbf16>
    %c2 = arith.constant 2 : index
    %c0_7 = arith.constant 0 : index
    %c0_8 = arith.constant 0 : index
    %15 = vector.load %arg3[%c2, %c0_7, %c0_8] : memref<3x16x128xbf16, #tpu.memory_space<vmem>>, vector<1x16x128xbf16>
    %16 = vector.shape_cast %15 : vector<1x16x128xbf16> to vector<16x128xbf16>
    %cst_9 = arith.constant dense<0.000000e+00> : vector<16x128xf32>
    %17 = tpu.matmul %14, %16, %cst_9 {dimension_numbers = #tpu.dot_dimension_numbers<[1], [0], [0], [1], [0, 0, 1, 1], [], []>} : vector<16x16xbf16>, vector<16x128xbf16>, vector<16x128xf32> -> vector<16x128xf32>
    %18 = arith.addf %13, %17 : vector<16x128xf32>
    %c0_10 = arith.constant 0 : index
    %c0_11 = arith.constant 0 : index
    %19 = vector.load %arg4[%c0_10, %c0_11] : memref<1x128xf32, #tpu.memory_space<vmem>>, vector<1x128xf32>
    %20 = vector.broadcast %19 : vector<1x128xf32> to vector<16x128xf32>
    %21 = arith.addf %18, %20 : vector<16x128xf32>
    %cst_12 = arith.constant 0.000000e+00 : f32
    %22 = vector.broadcast %cst_12 : f32 to vector<16x128xf32>
    %23 = arith.maximumf %21, %22 : vector<16x128xf32>
    %c0_13 = arith.constant 0 : index
    %c0_14 = arith.constant 0 : index
    %24 = vector.load %arg5[%c0_13, %c0_14] : memref<1x128xf32, #tpu.memory_space<vmem>>, vector<1x128xf32>
    %25 = vector.broadcast %24 : vector<1x128xf32> to vector<16x128xf32>
    %26 = arith.mulf %23, %25 : vector<16x128xf32>
    %c0_15 = arith.constant 0 : index
    %c0_16 = arith.constant 0 : index
    %27 = vector.load %arg6[%c0_15, %c0_16] : memref<1x128xf32, #tpu.memory_space<vmem>>, vector<1x128xf32>
    %28 = vector.broadcast %27 : vector<1x128xf32> to vector<16x128xf32>
    %29 = arith.addf %26, %28 : vector<16x128xf32>
    %30 = arith.truncf %29 : vector<16x128xf32> to vector<16x128xbf16>
    %c0_17 = arith.constant 0 : index
    %c0_18 = arith.constant 0 : index
    %c0_19 = arith.constant 0 : index
    %31 = vector.load %arg7[%c0_17, %c0_18, %c0_19] : memref<1x16x128xbf16, #tpu.memory_space<vmem>>, vector<1x16x128xbf16>
    %32 = vector.shape_cast %31 : vector<1x16x128xbf16> to vector<16x128xbf16>
    %33 = vector.shape_cast %30 : vector<16x128xbf16> to vector<1x16x128xbf16>
    tpu.vector_store %arg7[%c0_17, %c0_18, %c0_19], %33 {strides = array<i32>} : memref<1x16x128xbf16, #tpu.memory_space<vmem>>, vector<1x16x128xbf16>,
    return
  }
  func.func @transform_0(%arg0: i32, %arg1: i32) -> (i32, i32, i32) {
    %c0_i32 = arith.constant 0 : i32
    %c0_i32_0 = arith.constant 0 : i32
    %c0_i32_1 = arith.constant 0 : i32
    return %arg0, %c0_i32, %c0_i32_0 : i32, i32, i32
  }
  func.func @transform_1(%arg0: i32, %arg1: i32) -> (i32, i32, i32) {
    %c0_i32 = arith.constant 0 : i32
    %c0_i32_0 = arith.constant 0 : i32
    %c0_i32_1 = arith.constant 0 : i32
    %c0_i32_2 = arith.constant 0 : i32
    return %c0_i32, %c0_i32_0, %c0_i32_1 : i32, i32, i32
  }
  func.func @transform_2(%arg0: i32, %arg1: i32) -> (i32, i32) {
    %c0_i32 = arith.constant 0 : i32
    %c0_i32_0 = arith.constant 0 : i32
    %c0_i32_1 = arith.constant 0 : i32
    return %c0_i32, %c0_i32_0 : i32, i32
  }
  func.func @transform_3(%arg0: i32, %arg1: i32) -> (i32, i32) {
    %c0_i32 = arith.constant 0 : i32
    %c0_i32_0 = arith.constant 0 : i32
    %c0_i32_1 = arith.constant 0 : i32
    return %c0_i32, %c0_i32_0 : i32, i32
  }
  func.func @transform_4(%arg0: i32, %arg1: i32) -> (i32, i32) {
    %c0_i32 = arith.constant 0 : i32
    %c0_i32_0 = arith.constant 0 : i32
    %c0_i32_1 = arith.constant 0 : i32
    return %c0_i32, %c0_i32_0 : i32, i32
  }
  func.func @transform_5(%arg0: i32, %arg1: i32) -> (i32, i32, i32) {
    %c0_i32 = arith.constant 0 : i32
    %c0_i32_0 = arith.constant 0 : i32
    return %arg0, %arg1, %c0_i32 : i32, i32, i32
  }
}

</mosaic_0001>

<bundles_post_ra>
// kernel: tpu_custom_call.1
= control target key start
LH: loop header
LB: loop body
LE: loop exit
PB: predicated region body
PF: predicated region fallthrough
CT: control target
= control target key end

     0   :  { %10 = vsyncpa [#allocation3], 0  ;;  %s942_s0 = inlined_call_operand.vmem [shape: bf16[2,24,16], index: 0, kind: input, shape index: {}]   ;;  %s943_s1 = inlined_call_operand.vmem [shape: bf16[3,16,128], index: 1, kind: input, shape index: {}]   ;;  %s944_s2 = inlined_call_operand.vmem [shape: f32[1,128], index: 2, kind: input, shape index: {}]   ;;  %s945_s3 = inlined_call_operand.vmem [shape: f32[1,128], index: 3, kind: input, shape index: {}]   ;;  %s946_s4 = inlined_call_operand.vmem [shape: f32[1,128], index: 4, kind: input, shape index: {}]   ;;  %s947_s5 = inlined_call_operand.hbm [shape: bf16[2,16,128], index: 5, kind: output, shape index: {}]  }
   0x1   :  { %12 = vsyncpa [#allocation3 + $0x1], 0  ;;  %s803_s18 = smov 0   ;;  %s805_s19 = smov 0  }
   0x2   :  { %s807_s20 = smov 0   ;;  %s809_s21 = smov 0  }
   0x3   :  { %s811_s22 = smov 0   ;;  %s813_s23 = smov 0  }
   0x4 LB: > { %s562_s24 = sadd.s32 4294967295, %s766_s23   ;;  %s563_s25 = sadd.s32 4294967294, %s766_s23   ;;  %s766_s23 = sphi %s813_s23, %s18_s23   ;;  %s762_s22 = sphi %s811_s22, %s954_s22   ;;  %s758_s21 = sphi %s809_s21, %s953_s21   ;;  %s754_s20 = sphi %s807_s20, %s952_s20   ;;  %s750_s19 = sphi %s805_s19, %s951_s19   ;;  %s746_s18 = sphi %s803_s18, %s950_s18  }
   0x5   : > { %s30_s26 = sadd.s32 1, %s762_s22  ;;  %s149_s27 = sadd.s32 1, %s754_s20 }
   0x6   : > { %p32_p0 = scmp.ge.s32.totalorder %s30_s26, 2  ;;  %p159_p1 = scmp.ne.s32.totalorder %s754_s20, %s750_s19 }
   0x7   : > { %p160_p2 = scmp.eq.s32.totalorder %s562_s24, 1  ;;  %p165_p3 = scmp.ne.s32.totalorder %s750_s19, %s746_s18 }
   0x8   : > { %s956_s26 = smov (%p32_p0, %s30_s26), 0  ;;  %p166_p5 = scmp.eq.s32.totalorder %s563_s25, 1 }
   0x9   : > { %p843_p4 = por %p160_p2, %p159_p1  ;;  %s144_s29 = ssub.s32 %s762_s22, %s956_s26 }
   0xa   : > { %p566_p6 = scmp.ge.s32.totalorder %s766_s23, 1  ;;  %p147_p7 = scmp.eq.s32.totalorder %s144_s29, 0 }
   0xb   : > { %p850_p8 = por %p166_p5, %p165_p3  ;;  %p204_p9 = scmp.lt.s32.totalorder %s766_s23, 3 }
   0xc   : > { %s856_s6 = scalar_select %p147_p7, %s754_s20, %s149_s27  }
   0xd   : > { %p205_p10 = pnand %p566_p6, %p204_p9 }
   0xe   : > { %v683_v0 = vld [vmem:[%s943_s1 + $0x8] sm:$0xff] (!%p205_p10)   ;;  %v768_v1 = vmov (!%p205_p10), 0.0   ;;  %v684_v2 = vld [vmem:[%s943_s1] sm:$0xff] (!%p205_p10)   ;;  %vm769_vm0 = vmmov (!%p205_p10), 0   ;;  %p232_p11 = scmp.lt.s32.totalorder (!%p205_p10), %s758_s21, 1  ;;  %vm279_vm1 = vcmask (!%p205_p10), 130048  }
   0xf   : > { %208 = sbr.rel (%p205_p10) target bundleno = 284 (0x11c), region = 40  ;;  %605 = vmatprep.subr.bf16.mxu0 (!%p205_p10), %v768_v1  ;;  %611 = vmatprep.subr.bf16.mxu1 (!%p205_p10), %v768_v1  ;;  %vm260_vm2 = vsmask.f32 (!%p205_p10), 7424  ;;  %v687_v11 = vld [vmem:[%s943_s1 + $0x10] sm:$0xff] (!%p205_p10)   ;;  %vm376_vm3 = vcmask (!%p205_p10), 1046528   ;;  %s229_s27 = sand.u32 (!%p205_p10), 1, %s750_s19  }
  0x10   : > { %606 = vmatpush3.bf16.msra.mxu0 (!%p205_p10), %v683_v0  ;;  %607 = vmatprep.mubr.msk.bf16.mxu0 (!%p205_p10), %vm769_vm0, %v768_v1  ;;  %v581_v27 = vld [vmem:[%s944_s2] ss:$0 sm:$0xff] (!%p205_p10)  ;;  %s567_s29 = sshll.u32 (!%p205_p10), %s229_s27, 3  ;;  %s896_s17 = scalar_lea.sflag (!%p205_p10), [#allocation3], %s229_s27 }
  0x11   : > { %612 = vmatpush3.bf16.msra.mxu1 (!%p205_p10), %v684_v2  ;;  %613 = vmatprep.mubr.msk.bf16.mxu1 (!%p205_p10), %vm769_vm0, %v768_v1  ;;  %v582_v34 = vld [vmem:[%s945_s3] ss:$0 sm:$0xff] (!%p205_p10) }
  0x12   : > { %617 = vmatprep.subr.bf16.mxu0 (!%p205_p10), %v768_v1  ;;  %v583_v39 = vld [vmem:[%s946_s4] ss:$0 sm:$0xff] (!%p205_p10) }
  0x16   : > { %s233_s11 = scalar_select %p232_p11, %s758_s21, 1 }
  0x18   : > { %s623_s12 = smul.u32 12, %s233_s11  ;;  %s593_s11 = sshll.u32 %s758_s21, 7 }
  0x19   : > { %s892_s16 = scalar_lea.hbm %s947_s5, %s593_s11  ;;  %s770_s21 = smov [#allocation2]  }
  0x1a   : > { %s236_s15 = scalar_lea.vmem %s942_s0, %s623_s12  ;;  %s231_s12 = scalar_lea.vmem [#allocation2], %s567_s29 }
  0x1b   : > { %v685_v3 = vld [vmem:[%s236_s15] sm:$0xff]   ;;  %v686_v4 = vld [vmem:[%s236_s15 + $0x8] ss:$0 sps:$4 sm:$0xff]   ;;  %s487_s13 = sshll.u32 %s231_s12, 4  ;;  %s692_s25 = sshll.u32 %s770_s21, 4  ;;  %s894_s13 = int_to_ptr.vmem [resolvable:$true] %s487_s13  ;;  %s693_s25 = int_to_ptr.vmem [resolvable:$false] %s692_s25 }
  0x1c   : > { %v262_v5 = vshrl.u32 %v685_v3, 16  ;;  %v264_v6 = vshll.u32 %v685_v3, 16  ;;  %v269_v7 = vshll.u32 %v686_v4, 16  ;;  %614 = vmatmul.mubr.msk.bf16.vlgmr.msra.gmra.mrb[0].mxu1 %vm279_vm1, %v685_v3  ;;  %v377_v13 = vrot.slane %v685_v3, 1  ;;  %s688_s24 = scalar_lea.vmem %s894_s13, 128  ;;  %s694_s29 = scalar_lea.vmem %s693_s25, 256 }
  0x1d   : > { %v378_v14 = vrot.slane %v686_v4, 1  ;;  %p689_p12 = scmp.ne.s32.totalorder %s894_s13, %s688_s24  ;;  %p695_p1 = scmp.lt.s32.totalorder %s894_s13, %s693_s25 }
  0x1e   : > { %v266_v8 = vrot.slane %v264_v6, 1  ;;  %v271_v9 = vrot.slane %v269_v7, 1  ;;  %p696_p2 = scmp.lt.s32.totalorder %s694_s29, %s688_s24 }
  0x1f   : > { %v379_v15 = vsel %vm376_vm3, %v377_v13, %v378_v14  ;;  %p690_p13 = pnand %p689_p12, %p843_p4 }
  0x20   : > { %v267_v10 = vor.u32 %v266_v8, %v262_v5  ;;  %p697_p3 = por %p696_p2, %p695_p1 }
  0x21   : > { %p691_p0 = pneg %p690_p13 }
  0x22   : > { %v272_v12 = vsel %vm260_vm2, %v267_v10, %v271_v9 }
  0x23   : > { %608 = vmatmul.mubr.msk.bf16.vlgmr.msra.gmra.mrb[0].mxu0 %vm279_vm1, %v272_v12  ;;  %p698_p5 = pnand %p697_p3, %p691_p0 }
  0x24   : > { %618 = vmatpush3.bf16.msra.mxu0 %v687_v11  ;;  %619 = vmatprep.mubr.msk.bf16.mxu0 %vm769_vm0, %v768_v1 }
  0x2b   : > { %620 = vmatmul.mubr.msk.bf16.vlgmr.msra.gmra.mrb[4].mxu0 %vm279_vm1, %v379_v15 }
  0xef   : > { %v366_v16 = vpop.f32.mrb[0].mxu1 }
  0xf0   : > { %v615_v17 = vpop.f32.mrb[1].mxu1 }
  0xf1   : > { %v369_v18 = vpop.f32.mrb[2].mxu1 }
  0xf2   : > { %v616_v19 = vpop.f32.mrb[3].mxu1 }
  0xf6   : > { %v317_v20 = vpop.f32.mrb[0].mxu0 }
  0xf7   : > { %v367_v21 = vadd.f32 %v366_v16, %v317_v20  ;;  %v609_v22 = vpop.f32.mrb[1].mxu0 }
  0xf8   : > { %v320_v23 = vpop.f32.mrb[2].mxu0 }
  0xf9   : > { %v370_v24 = vadd.f32 %v369_v18, %v320_v23  ;;  %v610_v25 = vpop.f32.mrb[3].mxu0 }
  0xfe   : > { %v423_v26 = vpop.f32.mrb[4].mxu0 }
  0xff   : > { %v430_v28 = vadd.f32 %v423_v26, %v367_v21  ;;  %v621_v29 = vpop.f32.mrb[5].mxu0 }
 0x100   : > { %v426_v30 = vpop.f32.mrb[6].mxu0 }
 0x101   : > { %v439_v31 = vadd.f32 %v581_v27, %v430_v28  ;;  %v431_v32 = vadd.f32 %v426_v30, %v370_v24  ;;  %v622_v33 = vpop.f32.mrb[7].mxu0 }
 0x103   : > { %v441_v35 = vmax.f32 %v439_v31, 0.0  ;;  %v440_v36 = vadd.f32 %v581_v27, %v431_v32 }
 0x105   : > { %v450_v37 = vmul.f32 %v582_v34, %v441_v35  ;;  %v442_v38 = vmax.f32 %v440_v36, 0.0 }
 0x107   : > { %v451_v40 = vmul.f32 %v582_v34, %v442_v38  ;;  %v459_v41 = vadd.f32 %v583_v39, %v450_v37 }
 0x109   : > { %v460_v42 = vadd.f32 %v583_v39, %v451_v40 }
 0x10b   : > { %v597_v43 = vpack.c.bf16 %v460_v42, %v459_v41 }
 0x10d   : > { %598 = vst [vmem:[%s231_s12] sm:$0xff] %v597_v43  }
 0x10e   : > { %701 = shalt.err (!%p698_p5)
}
 0x10f   : > { %s702_s27 = scalar_lea.hbm %s892_s16, 128  ;;  %s706_s9 = scalar_lea.hbm %s947_s5, 256 }
 0x110   : > { %p703_p6 = scmp.ne.s32.totalorder %s892_s16, %s702_s27  ;;  %p707_p10 = scmp.lt.u32.totalorder %s892_s16, %s947_s5 }
 0x111   : > { %p708_p11 = scmp.lt.u32.totalorder %s706_s9, %s702_s27  ;;  %p710_p13 = scmp.lt.u32.totalorder %s702_s27, %s892_s16 }
 0x112   : > { %p704_p7 = pnand %p703_p6, %p843_p4 }
 0x113   : > { %p709_p12 = por %p708_p11, %p707_p10 }
 0x114   : > { %p705_p9 = pneg %p704_p7 }
 0x115   : > { %p711_p0 = por %p710_p13, %p709_p12 }
 0x117   : > { %p712_p1 = pnand %p711_p0, %p705_p9 }
 0x119   : > { %715 = shalt.err (!%p712_p1)
}
 0x11a   : > { %s771_s12 = smov 64   ;;  %s772_s14 = smov 4  }
 0x11b   : > { %624 = dma.vmem_to_hbm [thread:$0]  (%p843_p4), %s894_s13, 128, %s892_s16, %s896_s17, %s771_s12, %s771_s12, %s772_s14  }
 0x11c PF: > { %p630_p2 = scmp.ge.s32.totalorder %s766_s23, 2  ;;  %s502_s15 = sand.u32 1, %s746_s18  }
 0x11d   : > { %s503_s24 = scalar_lea.sflag [#allocation3], %s502_s15 }
 0x11e   : > { %p627_p3 = pnand %p630_p2, %p850_p8 }
 0x120   : > { %741 = dma.done.wait (!%p627_p3), %s503_s24, 128  }
 0x121   : > { %743 = vsyncadd (!%p627_p3), %s503_s24, 4294967168  ;;  %s18_s23 = sadd.s32 1, %s766_s23   ;;  %s950_s18 = smov %s750_s19 }
 0x122   : > { %p15_p5 = scmp.ge.s32.totalorder %s18_s23, 4   ;;  %s951_s19 = smov %s754_s20 }
 0x123   : > { %s952_s20 = smov %s856_s6  ;;  %s953_s21 = smov %s762_s22 }
 0x124   : > { %s954_s22 = smov %s956_s26  ;;  %17 = sbr.rel (!%p15_p5) target bundleno = 4 (0x4), region = 78 }
 0x12b   :  { %508 = vsyncpa [#allocation3], 1 }
 0x12c   :  { %510 = vsyncpa [#allocation3 + $0x1], 1 }

</bundles_post_ra>
